<compile_context>
chip_gen: v7x
topology: tpu7x:2x2x1
jax: 0.10.0
libtpu: 0.0.40
codegen_flags: <defaults>
</compile_context>

<pallas_src>
import jax
import jax.numpy as jnp
from jax.experimental import pallas as pl
from jax.experimental.pallas import tpu as pltpu


def _expert_kernel(x_ref, w1_ref, b1_ref, w2_ref, b2_ref, o_ref):
    # x_ref : (TM, D)   -- one token tile (shared across experts)
    # w1_ref: (D, D)    -- this expert's first-layer weight, (in, out) layout
    # b1_ref: (1, D)
    # w2_ref: (D, D)
    # b2_ref: (1, D)
    # o_ref : (TM, D)   -- this expert's output tile
    x = x_ref[...]
    w1 = w1_ref[...]
    w2 = w2_ref[...]
    b1 = b1_ref[...].astype(jnp.float32)
    b2 = b2_ref[...].astype(jnp.float32)

    # First linear + ReLU: MXU matmul with f32 accumulation, bias add in f32.
    h = jnp.dot(x, w1, preferred_element_type=jnp.float32) + b1
    h = jnp.maximum(h, 0.0)

    # Keep the second matmul's operands in the compute dtype (bf16-native MXU
    # when compute_dtype=bf16), still accumulating in f32.
    h = h.astype(w2.dtype)
    y = jnp.dot(h, w2, preferred_element_type=jnp.float32) + b2
    o_ref[...] = y.astype(o_ref.dtype)


def _round_up(a, b):
    return (a + b - 1) // b * b


def expert_forward(x, w1, b1, w2, b2, *, tile_m=None, compute_dtype=None):
    """x: (batch, seq, d_model); w*: (E, D, D) in (in, out) layout; b*: (E, D).

    Returns (E, batch, seq, d_model) in x.dtype.
    """
    batch, seq, d_model = x.shape
    num_experts = w1.shape[0]
    n_tokens = batch * seq

    if compute_dtype is None:
        compute_dtype = x.dtype
    out_dtype = x.dtype

    # ---- token tiling -------------------------------------------------------
    # TM is 8-aligned (sublane); default 256 (good MXU M-granularity on
    # v6e/v7x, fine on v5e) unless the whole problem is smaller.
    if tile_m is None:
        tile_m = min(256, _round_up(n_tokens, 8))
    tile_m = max(8, _round_up(tile_m, 8))
    n_pad = _round_up(n_tokens, tile_m)
    n_tiles = n_pad // tile_m

    x2d = x.reshape(n_tokens, d_model).astype(compute_dtype)
    if n_pad != n_tokens:
        x2d = jnp.pad(x2d, ((0, n_pad - n_tokens), (0, 0)))

    w1c = w1.astype(compute_dtype)
    w2c = w2.astype(compute_dtype)
    b1_3d = b1.reshape(num_experts, 1, d_model)
    b2_3d = b2.reshape(num_experts, 1, d_model)

    # ---- VMEM budget / cost estimate ---------------------------------------
    c_bytes = jnp.dtype(compute_dtype).itemsize
    o_bytes = jnp.dtype(out_dtype).itemsize
    b_bytes = jnp.dtype(b1.dtype).itemsize
    vmem_need = (
        2 * tile_m * d_model * c_bytes            # x tile, double-buffered
        + 2 * tile_m * d_model * o_bytes          # out tile, double-buffered
        + 2 * 2 * d_model * d_model * c_bytes     # W1 + W2, double-buffered
        + 2 * 2 * d_model * b_bytes               # biases
        + 2 * tile_m * d_model * 4                # f32 intermediates (h, y)
    )
    vmem_limit = min(max(2 * int(vmem_need) + (4 << 20), 32 << 20), 128 << 20)

    flops = 4 * num_experts * n_pad * d_model * d_model
    bytes_accessed = (
        num_experts * n_pad * d_model * c_bytes           # x read per expert
        + 2 * num_experts * d_model * d_model * c_bytes   # weights
        + 2 * num_experts * d_model * b_bytes             # biases
        + num_experts * n_pad * d_model * o_bytes         # output
    )

    out = pl.pallas_call(
        _expert_kernel,
        out_shape=jax.ShapeDtypeStruct((num_experts, n_pad, d_model), out_dtype),
        grid_spec=pltpu.PrefetchScalarGridSpec(
            num_scalar_prefetch=0,
            # Expert axis OUTERMOST, token tiles inner: weight index maps are
            # constant across the inner axis, so W1/W2 are fetched once per
            # expert, not once per token tile.
            grid=(num_experts, n_tiles),
            in_specs=[
                pl.BlockSpec((tile_m, d_model), lambda e, t: (t, 0)),             # x tile
                pl.BlockSpec((None, d_model, d_model), lambda e, t: (e, 0, 0)),   # W1[e]
                pl.BlockSpec((None, 1, d_model), lambda e, t: (e, 0, 0)),         # b1[e]
                pl.BlockSpec((None, d_model, d_model), lambda e, t: (e, 0, 0)),   # W2[e]
                pl.BlockSpec((None, 1, d_model), lambda e, t: (e, 0, 0)),         # b2[e]
            ],
            out_specs=pl.BlockSpec((None, tile_m, d_model), lambda e, t: (e, t, 0)),
        ),
        compiler_params=pltpu.CompilerParams(
            dimension_semantics=("parallel", "parallel"),
            vmem_limit_bytes=vmem_limit,
        ),
        cost_estimate=pl.CostEstimate(
            flops=flops, transcendentals=0, bytes_accessed=bytes_accessed),
    )(x2d, w1c, b1_3d, w2c, b2_3d)

    out = out[:, :n_tokens, :]
    return out.reshape(num_experts, batch, seq, d_model)


def init_expert_params(key, num_experts, d_model, dtype=jnp.float32):
    """Deterministic init mimicking nn.Linear: U(-1/sqrt(d), 1/sqrt(d))."""
    bound = 1.0 / jnp.sqrt(jnp.asarray(d_model, dtype=jnp.float32))
    k1, k2, k3, k4 = jax.random.split(key, 4)
    # Stored directly in (in, out) layout so the kernel does x @ W.
    w1 = jax.random.uniform(k1, (num_experts, d_model, d_model), dtype, -bound, bound)
    b1 = jax.random.uniform(k2, (num_experts, d_model), dtype, -bound, bound)
    w2 = jax.random.uniform(k3, (num_experts, d_model, d_model), dtype, -bound, bound)
    b2 = jax.random.uniform(k4, (num_experts, d_model), dtype, -bound, bound)
    return w1, b1, w2, b2


def _reference(x, w1, b1, w2, b2):
    # Pure-JAX reference for a sanity check of kernel semantics.
    h = jnp.maximum(jnp.einsum("bsd,edf->ebsf", x, w1) + b1[:, None, None, :], 0.0)
    return jnp.einsum("ebsd,edf->ebsf", h, w2) + b2[:, None, None, :]


if __name__ == "__main__":
    key = jax.random.PRNGKey(0)
    kx, kp = jax.random.split(key)

    batch, seq, d_model, num_experts = 2, 8, 32, 4
    x = jax.random.normal(kx, (batch, seq, d_model), dtype=jnp.float32)
    w1, b1, w2, b2 = init_expert_params(kp, num_experts, d_model)
    ref = _reference(x, w1, b1, w2, b2)

    # f32 path (tight tolerance).
    out = expert_forward(x, w1, b1, w2, b2)
    out = jax.block_until_ready(out)
    assert out.shape == (num_experts, batch, seq, d_model), out.shape
    assert jnp.allclose(out, ref, atol=1e-5, rtol=1e-5), "f32 mismatch vs reference"

    # Ragged token count -> exercises padding + slicing of the token tiles.
    xr = jax.random.normal(kx, (3, 5, d_model), dtype=jnp.float32)
    out_r = jax.block_until_ready(expert_forward(xr, w1, b1, w2, b2))
    ref_r = _reference(xr, w1, b1, w2, b2)
    assert out_r.shape == (num_experts, 3, 5, d_model), out_r.shape
    assert jnp.allclose(out_r, ref_r, atol=1e-5, rtol=1e-5), "ragged mismatch"

    # bf16-compute path (MXU-native operands, f32 accumulation) - loose check.
    out_bf16 = expert_forward(x, w1, b1, w2, b2, compute_dtype=jnp.bfloat16)
    out_bf16 = jax.block_until_ready(out_bf16)
    assert jnp.allclose(out_bf16.astype(jnp.float32), ref, atol=2e-1, rtol=1e-1), \
        "bf16 path drifted beyond expected rounding"

    print("KERNEL_OK")
</pallas_src>

<mosaic_0001>
module attributes {stable_mosaic.version = 11 : i64} {
  func.func @_expert_kernel(%arg0: i32, %arg1: i32, %arg2: memref<16x32xf32, #tpu.memory_space<vmem>>, %arg3: memref<1x32x32xf32, #tpu.memory_space<vmem>>, %arg4: memref<1x1x32xf32, #tpu.memory_space<vmem>>, %arg5: memref<1x32x32xf32, #tpu.memory_space<vmem>>, %arg6: memref<1x1x32xf32, #tpu.memory_space<vmem>>, %arg7: memref<1x16x32xf32, #tpu.memory_space<vmem>>) attributes {dimension_semantics = [#tpu.dimension_semantics<parallel>, #tpu.dimension_semantics<parallel>], iteration_bounds = array<i64: 4, 1>, scalar_prefetch = 0 : i64, scratch_operands = 0 : i64, tpu.core_type = #tpu.core_type<tc>, window_params = [{transform_indices = @transform_0, window_bounds = array<i64: 16, 32>}, {transform_indices = @transform_1, window_bounds = array<i64: 1, 32, 32>}, {transform_indices = @transform_2, window_bounds = array<i64: 1, 1, 32>}, {transform_indices = @transform_3, window_bounds = array<i64: 1, 32, 32>}, {transform_indices = @transform_4, window_bounds = array<i64: 1, 1, 32>}, {transform_indices = @transform_5, window_bounds = array<i64: 1, 16, 32>}]} {
    %c0 = arith.constant 0 : index
    %c0_0 = arith.constant 0 : index
    %0 = vector.load %arg2[%c0, %c0_0] : memref<16x32xf32, #tpu.memory_space<vmem>>, vector<16x32xf32>
    %c0_1 = arith.constant 0 : index
    %c0_2 = arith.constant 0 : index
    %c0_3 = arith.constant 0 : index
    %1 = vector.load %arg3[%c0_1, %c0_2, %c0_3] : memref<1x32x32xf32, #tpu.memory_space<vmem>>, vector<1x32x32xf32>
    %2 = vector.shape_cast %1 : vector<1x32x32xf32> to vector<32x32xf32>
    %c0_4 = arith.constant 0 : index
    %c0_5 = arith.constant 0 : index
    %c0_6 = arith.constant 0 : index
    %3 = vector.load %arg5[%c0_4, %c0_5, %c0_6] : memref<1x32x32xf32, #tpu.memory_space<vmem>>, vector<1x32x32xf32>
    %4 = vector.shape_cast %3 : vector<1x32x32xf32> to vector<32x32xf32>
    %c0_7 = arith.constant 0 : index
    %c0_8 = arith.constant 0 : index
    %c0_9 = arith.constant 0 : index
    %5 = vector.load %arg4[%c0_7, %c0_8, %c0_9] : memref<1x1x32xf32, #tpu.memory_space<vmem>>, vector<1x1x32xf32>
    %6 = vector.shape_cast %5 : vector<1x1x32xf32> to vector<1x32xf32>
    %c0_10 = arith.constant 0 : index
    %c0_11 = arith.constant 0 : index
    %c0_12 = arith.constant 0 : index
    %7 = vector.load %arg6[%c0_10, %c0_11, %c0_12] : memref<1x1x32xf32, #tpu.memory_space<vmem>>, vector<1x1x32xf32>
    %8 = vector.shape_cast %7 : vector<1x1x32xf32> to vector<1x32xf32>
    %cst = arith.constant dense<0.000000e+00> : vector<16x32xf32>
    %9 = tpu.matmul %0, %2, %cst {dimension_numbers = #tpu.dot_dimension_numbers<[1], [0], [0], [1], [0, 0, 1, 1], [], []>} : vector<16x32xf32>, vector<32x32xf32>, vector<16x32xf32> -> vector<16x32xf32>
    %10 = vector.broadcast %6 : vector<1x32xf32> to vector<16x32xf32>
    %11 = arith.addf %9, %10 : vector<16x32xf32>
    %cst_13 = arith.constant 0.000000e+00 : f32
    %12 = vector.broadcast %cst_13 : f32 to vector<16x32xf32>
    %13 = arith.maximumf %11, %12 : vector<16x32xf32>
    %cst_14 = arith.constant dense<0.000000e+00> : vector<16x32xf32>
    %14 = tpu.matmul %13, %4, %cst_14 {dimension_numbers = #tpu.dot_dimension_numbers<[1], [0], [0], [1], [0, 0, 1, 1], [], []>} : vector<16x32xf32>, vector<32x32xf32>, vector<16x32xf32> -> vector<16x32xf32>
    %15 = vector.broadcast %8 : vector<1x32xf32> to vector<16x32xf32>
    %16 = arith.addf %14, %15 : vector<16x32xf32>
    %c0_15 = arith.constant 0 : index
    %c0_16 = arith.constant 0 : index
    %c0_17 = arith.constant 0 : index
    %17 = vector.load %arg7[%c0_15, %c0_16, %c0_17] : memref<1x16x32xf32, #tpu.memory_space<vmem>>, vector<1x16x32xf32>
    %18 = vector.shape_cast %17 : vector<1x16x32xf32> to vector<16x32xf32>
    %19 = vector.shape_cast %16 : vector<16x32xf32> to vector<1x16x32xf32>
    tpu.vector_store %arg7[%c0_15, %c0_16, %c0_17], %19 {strides = array<i32>} : memref<1x16x32xf32, #tpu.memory_space<vmem>>, vector<1x16x32xf32>,
    return
  }
  func.func @transform_0(%arg0: i32, %arg1: i32) -> (i32, i32) {
    %c0_i32 = arith.constant 0 : i32
    %c0_i32_0 = arith.constant 0 : i32
    return %arg1, %c0_i32 : i32, i32
  }
  func.func @transform_1(%arg0: i32, %arg1: i32) -> (i32, i32, i32) {
    %c0_i32 = arith.constant 0 : i32
    %c0_i32_0 = arith.constant 0 : i32
    %c0_i32_1 = arith.constant 0 : i32
    return %arg0, %c0_i32, %c0_i32_0 : i32, i32, i32
  }
  func.func @transform_2(%arg0: i32, %arg1: i32) -> (i32, i32, i32) {
    %c0_i32 = arith.constant 0 : i32
    %c0_i32_0 = arith.constant 0 : i32
    %c0_i32_1 = arith.constant 0 : i32
    return %arg0, %c0_i32, %c0_i32_0 : i32, i32, i32
  }
  func.func @transform_3(%arg0: i32, %arg1: i32) -> (i32, i32, i32) {
    %c0_i32 = arith.constant 0 : i32
    %c0_i32_0 = arith.constant 0 : i32
    %c0_i32_1 = arith.constant 0 : i32
    return %arg0, %c0_i32, %c0_i32_0 : i32, i32, i32
  }
  func.func @transform_4(%arg0: i32, %arg1: i32) -> (i32, i32, i32) {
    %c0_i32 = arith.constant 0 : i32
    %c0_i32_0 = arith.constant 0 : i32
    %c0_i32_1 = arith.constant 0 : i32
    return %arg0, %c0_i32, %c0_i32_0 : i32, i32, i32
  }
  func.func @transform_5(%arg0: i32, %arg1: i32) -> (i32, i32, i32) {
    %c0_i32 = arith.constant 0 : i32
    %c0_i32_0 = arith.constant 0 : i32
    return %arg0, %arg1, %c0_i32 : i32, i32, i32
  }
}

</mosaic_0001>

<bundles_post_ra>
// kernel: tpu_custom_call.1
= control target key start
LH: loop header
LB: loop body
LE: loop exit
PB: predicated region body
PF: predicated region fallthrough
CT: control target
= control target key end

     0   :  { %10 = vsyncpa [#allocation3], 0  ;;  %s1349_s0 = inlined_call_operand.hbm [shape: f32[16,32], index: 0, kind: input, shape index: {}]   ;;  %s1350_s1 = inlined_call_operand.hbm [shape: f32[4,32,32], index: 1, kind: input, shape index: {}]   ;;  %s1351_s2 = inlined_call_operand.vmem [shape: f32[4,1,32], index: 2, kind: input, shape index: {}]   ;;  %s1352_s3 = inlined_call_operand.hbm [shape: f32[4,32,32], index: 3, kind: input, shape index: {}]   ;;  %s1353_s4 = inlined_call_operand.vmem [shape: f32[4,1,32], index: 4, kind: input, shape index: {}]   ;;  %s1354_s5 = inlined_call_operand.hbm [shape: f32[4,16,32], index: 5, kind: output, shape index: {}]  }
   0x1   :  { %11 = vsyncpa [#allocation6], 0 }
   0x2   :  { %13 = vsyncpa [#allocation6 + $0x1], 0 }
   0x3   :  { %14 = vsyncpa [#allocation4], 0 }
   0x4   :  { %16 = vsyncpa [#allocation4 + $0x1], 0  ;;  %s1066_s18 = smov 0   ;;  %s1068_s19 = smov 0  }
   0x5   :  { %s1070_s20 = smov 0   ;;  %s1072_s21 = smov 0  }
   0x6   :  { %s1074_s22 = smov 0   ;;  %s1076_s23 = smov 0  }
   0x7 LB: > { %s34_s24 = sadd.s32 1, %s1022_s22  ;;  %s67_s25 = sadd.s32 1, %s1014_s20  ;;  %s1026_s23 = sphi %s1076_s23, %s22_s23   ;;  %s1022_s22 = sphi %s1074_s22, %s1384_s22   ;;  %s1018_s21 = sphi %s1072_s21, %s1383_s21   ;;  %s1014_s20 = sphi %s1070_s20, %s1382_s20   ;;  %s1010_s19 = sphi %s1068_s19, %s1381_s19   ;;  %s1006_s18 = sphi %s1066_s18, %s1380_s18  }
   0x8   : > { %p36_p0 = scmp.ge.s32.totalorder %s34_s24, 4  ;;  %p74_p1 = scmp.ne.s32.totalorder %s1014_s20, %s1010_s19 }
   0x9   : > { %p75_p2 = scmp.eq.s32.totalorder %s1026_s23, 0  ;;  %p796_p5 = scmp.lt.s32.totalorder %s1026_s23, 4 }
   0xa   : > { %s1386_s24 = smov (%p36_p0, %s34_s24), 0  ;;  %s226_s28 = sand.u32 1, %s1026_s23  }
   0xb   : > { %p1106_p3 = por %p75_p2, %p74_p1  ;;  %s64_s27 = ssub.s32 %s1022_s22, %s1386_s24 }
   0xc   : > { %p65_p4 = scmp.eq.s32.totalorder %s64_s27, 0  ;;  %s228_s29 = sand.u32 1, %s1014_s20  }
   0xd   : > { %s1118_s6 = sshll.u32 %s228_s29, 5  ;;  %s717_s7 = sshll.u32 %s1022_s22, 9 }
   0xe   : > { %s1116_s30 = scalar_select %p65_p4, %s1014_s20, %s67_s25  }
   0xf   : > { %s1124_s10 = scalar_lea.hbm %s1350_s1, %s717_s7  ;;  %s230_s11 = scalar_lea.vmem [#allocation5], %s1118_s6 }
  0x10   : > { %s237_s12 = sshll.u32 %s230_s11, 4  ;;  %p1131_p6 = pnand %p796_p5, %p1106_p3  ;;  %s1127_s12 = int_to_ptr.vmem [resolvable:$true] %s237_s12 }
  0x11   : > { %s1138_s16 = scalar_lea.hbm %s1352_s3, %s717_s7  ;;  %s1140_s17 = scalar_lea.sflag [#allocation6], %s226_s28 }
  0x12   : > { %s852_s25 = scalar_lea.hbm %s1124_s10, 512  ;;  %p854_p8 = pneg %p1131_p6 }
  0x13   : > { %p853_p7 = scmp.ne.s32.totalorder %s1124_s10, %s852_s25  ;;  %s857_s29 = scalar_lea.hbm %s1350_s1, 2048 }
  0x14   : > { %p858_p11 = scmp.lt.u32.totalorder %s1124_s10, %s1350_s1  ;;  %p859_p12 = scmp.lt.u32.totalorder %s857_s29, %s852_s25 }
  0x15   : > { %p855_p9 = pnand %p854_p8, %p853_p7  ;;  %p861_p0 = scmp.lt.u32.totalorder %s852_s25, %s1124_s10 }
  0x16   : > { %p860_p13 = por %p859_p12, %p858_p11 }
  0x17   : > { %p856_p10 = pneg %p855_p9 }
  0x18   : > { %p862_p2 = por %p861_p0, %p860_p13 }
  0x1a   : > { %p863_p3 = pnand %p862_p2, %p856_p10 }
  0x1c   : > { %866 = shalt.err (!%p863_p3)
}
  0x1d   : > { %s867_s28 = scalar_lea.vmem %s1127_s12, 512  ;;  %s1028_s7 = smov [#allocation5]  }
  0x1e   : > { %p868_p4 = scmp.ne.s32.totalorder %s1127_s12, %s867_s28  ;;  %s872_s11 = sshll.u32 %s1028_s7, 4  ;;  %s873_s11 = int_to_ptr.vmem [resolvable:$false] %s872_s11 }
  0x1f   : > { %s874_s14 = scalar_lea.vmem %s873_s11, 1024  ;;  %p875_p9 = scmp.lt.s32.totalorder %s1127_s12, %s873_s11 }
  0x20   : > { %p870_p5 = pnand %p868_p4, %p854_p8  ;;  %p876_p11 = scmp.lt.s32.totalorder %s874_s14, %s867_s28 }
  0x22   : > { %p871_p7 = pneg %p870_p5  ;;  %p877_p12 = por %p876_p11, %p875_p9 }
  0x24   : > { %p878_p13 = pnand %p877_p12, %p871_p7 }
  0x26   : > { %881 = shalt.err (!%p878_p13)
}
  0x27   : > { %s1355_s15 = smov 128   ;;  %s1357_s25 = smov 8  }
  0x28   : > { %787 = dma.hbm_to_vmem [thread:$0]  (!%p1131_p6), %s1124_s10, 512, %s1127_s12, %s1140_s17, %s1355_s15, %s1355_s15, %s1357_s25  }
  0x29   : > { %s257_s26 = scalar_lea.vmem [#allocation7], %s1118_s6  ;;  %s1173_s29 = sadd.s32 4294967295, %s1026_s23  }
  0x2a   : > { %s264_s27 = sshll.u32 %s257_s26, 4  ;;  %s691_s8 = sadd.s32 4294967294, %s1026_s23   ;;  %s1199_s27 = int_to_ptr.vmem [resolvable:$true] %s264_s27 }
  0x2b   : > { %p80_p10 = scmp.ne.s32.totalorder %s1010_s19, %s1006_s18  ;;  %p1359_p0 = scmp.eq.s32.totalorder %s1173_s29, 0 }
  0x2c   : > { %p184_p2 = scmp.eq.s32.totalorder %s1173_s29, 3  ;;  %p190_p3 = scmp.eq.s32.totalorder %s691_s8, 3 }
  0x2d   : > { %p692_p4 = scmp.ge.s32.totalorder %s1026_s23, 1  ;;  %p1183_p5 = por %p1359_p0, %p80_p10 }
  0x2e   : > { %p1190_p7 = por %p184_p2, %p74_p1  ;;  %p1194_p9 = por %p190_p3, %p80_p10 }
  0x2f   : > { %s1365_s10 = scalar_select %p1183_p5, 1, 0 }
  0x30   : > { %s1366_s6 = scalar_select %p1190_p7, 1, 0 }
  0x31   : > { %s1367_s12 = scalar_select %p1194_p9, 1, 0 }
  0x32   : > { %p197_p11 = scmp.lt.s32.totalorder %s1026_s23, 5  ;;  %s1031_s28 = smov [#allocation2]  }
  0x33   : > { %s1205_s7 = sshll.u32 %s1031_s28, 4  ;;  %s882_s11 = scalar_lea.hbm %s1138_s16, 512  ;;  %s213_s7 = int_to_ptr.vmem [resolvable:$true] %s1205_s7 }
  0x34   : > { %p1201_p12 = pnand %p692_p4, %p197_p11  ;;  %p883_p13 = scmp.ne.s32.totalorder %s1138_s16, %s882_s11 }
  0x35   : > { %s887_s8 = scalar_lea.hbm %s1352_s3, 2048  ;;  %p888_p3 = scmp.lt.u32.totalorder %s1138_s16, %s1352_s3 }
  0x36   : > { %s1368_s9 = scalar_select %p1201_p12, 1, 0 }
  0x37   : > { %p885_p10 = pnand %p883_p13, %p854_p8  ;;  %p889_p4 = scmp.lt.u32.totalorder %s887_s8, %s882_s11 }
  0x38   : > { %p891_p0 = scmp.lt.u32.totalorder %s882_s11, %s1138_s16 }
  0x39   : > { %p886_p2 = pneg %p885_p10  ;;  %p890_p11 = por %p889_p4, %p888_p3 }
  0x3b   : > { %p892_p9 = por %p891_p0, %p890_p11 }
  0x3d   : > { %p893_p7 = pnand %p892_p9, %p886_p2 }
  0x3f   : > { %896 = shalt.err (!%p893_p7)
}
  0x40   : > { %s897_s28 = scalar_lea.vmem %s1199_s27, 512  ;;  %s1032_s14 = smov [#allocation7]  }
  0x41   : > { %p898_p13 = scmp.ne.s32.totalorder %s1199_s27, %s897_s28  ;;  %s902_s26 = sshll.u32 %s1032_s14, 4  ;;  %s903_s26 = int_to_ptr.vmem [resolvable:$false] %s902_s26 }
  0x42   : > { %s904_s15 = scalar_lea.vmem %s903_s26, 1024  ;;  %p905_p5 = scmp.lt.s32.totalorder %s1199_s27, %s903_s26 }
  0x43   : > { %p900_p10 = pnand %p898_p13, %p854_p8  ;;  %p906_p3 = scmp.lt.s32.totalorder %s904_s15, %s897_s28 }
  0x45   : > { %p901_p1 = pneg %p900_p10  ;;  %p907_p4 = por %p906_p3, %p905_p5 }
  0x47   : > { %p908_p0 = pnand %p907_p4, %p901_p1 }
  0x49   : > { %911 = shalt.err (!%p908_p0)
}
  0x4a   : > { %s1369_s25 = smov 8   ;;  %s1370_s11 = smov 128  }
  0x4b   : > { %790 = dma.hbm_to_vmem [thread:$0]  (!%p1131_p6), %s1138_s16, 512, %s1199_s27, %s1140_s17, %s1370_s11, %s1370_s11, %s1369_s25  }
  0x4c   : > { %p1371_p8 = scmp.eq.s32.totalorder %s1173_s29, 0  ;;  %p1372_p7 = pneg %p1201_p12 }
  0x4d   : > { %s912_s14 = scalar_lea.hbm %s1349_s0, 256 }
  0x4e   : > { %p1242_p9 = pnand %p1372_p7, %p1371_p8  ;;  %p913_p5 = scmp.ne.s32.totalorder %s1349_s0, %s912_s14 }
  0x4f   : > { %p919_p11 = scmp.lt.u32.totalorder %s912_s14, %s1349_s0 }
  0x50   : > { %p914_p1 = pneg %p1242_p9 }
  0x52   : > { %p915_p6 = pnand %p914_p1, %p913_p5 }
  0x54   : > { %p916_p2 = pneg %p915_p6 }
  0x56   : > { %p921_p13 = pnand %p919_p11, %p916_p2 }
  0x58   : > { %924 = shalt.err (!%p921_p13)
}
  0x59   : > { %s925_s27 = scalar_lea.vmem %s213_s7, 256  ;;  %p933_p0 = scmp.lt.s32.totalorder %s213_s7, %s213_s7 }
  0x5a   : > { %p926_p10 = scmp.ne.s32.totalorder %s213_s7, %s925_s27  ;;  %p934_p8 = scmp.lt.s32.totalorder %s925_s27, %s925_s27 }
  0x5c   : > { %p928_p3 = pnand %p926_p10, %p914_p1  ;;  %p935_p7 = por %p934_p8, %p933_p0 }
  0x5e   : > { %p929_p4 = pneg %p928_p3 }
  0x60   : > { %p936_p12 = pnand %p935_p7, %p929_p4 }
  0x62   : > { %939 = shalt.err (!%p936_p12)
}
  0x63   : > { %783 = dma.hbm_to_vmem [thread:$0]  (!%p1242_p9), %s1349_s0, 256, %s213_s7, [#allocation3], %s1370_s11, %s1370_s11, %s1369_s25  }
  0x64   : > { %p1374_p5 = scmp.ne.s32.totalorder %s1368_s9, 0 }
  0x65   : > { %p1375_p1 = scmp.eq.s32.totalorder (!%p1374_p5), %s1173_s29, 0 }
  0x66   : > { %282 = sbr.rel (%p1374_p5) target bundleno = 574 (0x23e), region = 40 }
  0x6d   : > { %993 = dma.done.wait (%p1375_p1), [#allocation3], 256   ;;  %p1376_p6 = pmov %p1375_p1 }
  0x6e   : > { %s288_s8 = sand.u32 1, %s1173_s29   ;;  %s1273_s14 = sand.u32 1, %s1010_s19  }
  0x6f   : > { %995 = vsyncadd (%p1376_p6), [#allocation3], 4294967040  ;;  %s703_s26 = sshll.u32 %s1273_s14, 5  ;;  %s289_s15 = scalar_lea.sflag [#allocation6], %s288_s8 }
  0x70   : > { %s292_s16 = scalar_lea.vmem [#allocation5], %s703_s26  ;;  %p1377_p12 = scmp.ne.s32.totalorder %s1365_s10, 0 }
  0x72   : > { %997 = dma.done.wait (%p1377_p12), %s289_s15, 1024  }
  0x73   : > { %999 = vsyncadd (%p1377_p12), %s289_s15, 4294966272  ;;  %vm365_vm0 = vcmask 261120   ;;  %v349_v0 = vld [vmem:[%s292_s16] sm:$0xff]  ;;  %v350_v1 = vld [vmem:[%s292_s16 + $0x8] sm:$0xff]  ;;  %s301_s29 = scalar_lea.vmem [#allocation7], %s703_s26  ;;  %p340_p9 = scmp.lt.s32.totalorder %s1018_s21, 3 }
  0x74   : > { %v351_v2 = vld [vmem:[%s292_s16 + $0x10] sm:$0xff]  ;;  %v754_v3 = vpack.c.bf16 %v350_v1, %v349_v0  ;;  %v352_v4 = vld [vmem:[%s292_s16 + $0x18] sm:$0xff]  ;;  %v353_v7 = vld [vmem:[%s301_s29] sm:$0xff]  ;;  %s705_s11 = sshll.u32 %s1273_s14, 4  ;;  %s719_s26 = sshll.u32 %s1018_s21, 8 }
  0x75   : > { %v347_v5 = vld [vmem:[#allocation2] sm:$0xff]  ;;  %v758_v6 = vpack.c.bf16 %v352_v4, %v351_v2  ;;  %v354_v8 = vld [vmem:[%s301_s29 + $0x8] sm:$0xff]  ;;  %v348_v10 = vld [vmem:[#allocation2 + $0x8] sm:$0xff]  ;;  %s341_s10 = scalar_select %p340_p9, %s1018_s21, 3 }
  0x76   : > { %740 = vmatprep.mubr.msk.f32.mxu0 %vm365_vm0, %v347_v5  ;;  %755 = vmatprep.subr.bf16.mxu0 %v754_v3  ;;  %v762_v9 = vpack.c.bf16 %v354_v8, %v353_v7  ;;  %v355_v11 = vld [vmem:[%s301_s29 + $0x10] sm:$0xff]  ;;  %v356_v12 = vld [vmem:[%s301_s29 + $0x18] sm:$0xff]  ;;  %s338_s13 = scalar_lea.vmem [#allocation8], %s705_s11  ;;  %s1299_s29 = scalar_lea.hbm %s1354_s5, %s719_s26 }
  0x77   : > { %757 = vmatpush3.bf16.msra.mxu0 %v754_v3  ;;  %v766_v13 = vpack.c.bf16 %v356_v12, %v355_v11  ;;  %s342_s25 = scalar_lea.vmem %s1351_s2, %s341_s10  ;;  %s345_s28 = scalar_lea.vmem %s1353_s4, %s341_s10 }
  0x78   : > { %759 = vmatprep.subr.bf16.mxu0 %v758_v6  ;;  %763 = vmatprep.subr.bf16.mxu1 %v762_v9  ;;  %v706_v14 = vld [vmem:[%s342_s25] ss:$0 sm:$0xff]  ;;  %s554_s8 = sshll.u32 %s338_s13, 4  ;;  %s539_s10 = scalar_lea.sflag [#allocation4], %s1273_s14  ;;  %s1294_s8 = int_to_ptr.vmem [resolvable:$true] %s554_s8 }
  0x79   : > { %765 = vmatpush3.bf16.msra.mxu1 %v762_v9  ;;  %v709_v21 = vld [vmem:[%s345_s28] ss:$0 sm:$0xff]  ;;  %s940_s21 = scalar_lea.vmem %s1294_s8, 256  ;;  %p1378_p11 = scmp.ne.s32.totalorder %s1366_s6, 0 }
  0x7a   : > { %767 = vmatprep.subr.bf16.mxu1 %v766_v13  ;;  %p941_p2 = scmp.ne.s32.totalorder %s1294_s8, %s940_s21  ;;  %s1033_s9 = smov [#allocation8]  }
  0x7b   : > { %761 = vmatpush3.bf16.msra.mxu0 %v758_v6  ;;  %s944_s7 = sshll.u32 %s1033_s9, 4  ;;  %s945_s7 = int_to_ptr.vmem [resolvable:$false] %s944_s7 }
  0x7c   : > { %p942_p13 = pnand %p941_p2, %p1378_p11  ;;  %s946_s25 = scalar_lea.vmem %s945_s7, 512 }
  0x7d   : > { %769 = vmatpush3.bf16.msra.mxu1 %v766_v13  ;;  %p947_p3 = scmp.lt.s32.totalorder %s1294_s8, %s945_s7  ;;  %p948_p4 = scmp.lt.s32.totalorder %s946_s25, %s940_s21 }
  0x7e   : > { %741 = vmatmul.mubr.msk.f32.vlgmr.msra.gmra.mrb[0].mxu0 %vm365_vm0, %v348_v10  ;;  %p943_p10 = pneg %p942_p13 }
  0x7f   : > { %p949_p0 = por %p948_p4, %p947_p3 }
  0x81   : > { %p950_p8 = pnand %p949_p0, %p943_p10 }
 0x151   : > { %v742_v15 = vpop.f32.mrb[0].mxu0 }
 0x152   : > { %v444_v16 = vadd.f32 %v742_v15, %v706_v14  ;;  %v438_v17 = vpop.f32.mrb[1].mxu0 }
 0x153   : > { %v439_v18 = vadd.f32 %v706_v14, %v438_v17 }
 0x154   : > { %v448_v20 = vmax.f32 %v444_v16, 0.0 }
 0x155   : > { %v447_v19 = vmax.f32 %v439_v18, 0.0 }
 0x157   : > { %751 = vmatprep.mubr.msk.f32.mxu1 %vm365_vm0, %v447_v19 }
 0x158   : > { %752 = vmatmul.mubr.msk.f32.vlgmr.msra.gmra.mrb[0].mxu1 %vm365_vm0, %v448_v20 }
 0x22b   : > { %v753_v22 = vpop.f32.mrb[0].mxu1 }
 0x22c   : > { %v533_v23 = vadd.f32 %v753_v22, %v709_v21  ;;  %v527_v24 = vpop.f32.mrb[1].mxu1 }
 0x22d   : > { %v528_v25 = vadd.f32 %v709_v21, %v527_v24 }
 0x22e   : > { %537 = vst.msk [vmem:[%s338_s13 + $0x8] sm:$0xff] %vm365_vm0, %v533_v23 }
 0x22f   : > { %536 = vst.msk [vmem:[%s338_s13] sm:$0xff] %vm365_vm0, %v528_v25 }
 0x230   : > { %953 = shalt.err (!%p950_p8)
}
 0x231   : > { %s954_s11 = scalar_lea.hbm %s1299_s29, 256  ;;  %s958_s28 = scalar_lea.hbm %s1354_s5, 1024 }
 0x232   : > { %p955_p7 = scmp.ne.s32.totalorder %s1299_s29, %s954_s11  ;;  %p959_p6 = scmp.lt.u32.totalorder %s1299_s29, %s1354_s5 }
 0x233   : > { %p960_p12 = scmp.lt.u32.totalorder %s958_s28, %s954_s11  ;;  %p962_p2 = scmp.lt.u32.totalorder %s954_s11, %s1299_s29 }
 0x234   : > { %p956_p5 = pnand %p955_p7, %p1378_p11 }
 0x235   : > { %p961_p9 = por %p960_p12, %p959_p6 }
 0x236   : > { %p957_p1 = pneg %p956_p5 }
 0x237   : > { %p963_p13 = por %p962_p2, %p961_p9 }
 0x239   : > { %p964_p10 = pnand %p963_p13, %p957_p1 }
 0x23b   : > { %967 = shalt.err (!%p964_p10)
}
 0x23c   : > { %s1034_s15 = smov 128   ;;  %s1035_s16 = smov 8  }
 0x23d   : > { %778 = dma.vmem_to_hbm [thread:$0]  (%p1378_p11), %s1294_s8, 256, %s1299_s29, %s539_s10, %s1034_s15, %s1034_s15, %s1035_s16  }
 0x23e PF: > { %p798_p3 = scmp.ge.s32.totalorder %s1026_s23, 2  ;;  %s569_s21 = sand.u32 1, %s1006_s18  }
 0x23f   : > { %p1379_p4 = scmp.ne.s32.totalorder %s1367_s12, 0  ;;  %s570_s9 = scalar_lea.sflag [#allocation4], %s569_s21 }
 0x241   : > { %p792_p0 = pnand %p798_p3, %p1379_p4 }
 0x243   : > { %1001 = dma.done.wait (!%p792_p0), %s570_s9, 256  }
 0x244   : > { %1003 = vsyncadd (!%p792_p0), %s570_s9, 4294967040  ;;  %s22_s23 = sadd.s32 1, %s1026_s23   ;;  %s1380_s18 = smov %s1010_s19 }
 0x245   : > { %p19_p8 = scmp.ge.s32.totalorder %s22_s23, 6   ;;  %s1381_s19 = smov %s1014_s20 }
 0x246   : > { %s1382_s20 = smov %s1116_s30  ;;  %s1383_s21 = smov %s1022_s22 }
 0x247   : > { %s1384_s22 = smov %s1386_s24  ;;  %21 = sbr.rel (!%p19_p8) target bundleno = 7 (0x7), region = 108 }
 0x24e   :  { %575 = vsyncpa [#allocation3], 1 }
 0x24f   :  { %577 = vsyncpa [#allocation3 + $0x1], 1 }
 0x250   :  { %578 = vsyncpa [#allocation6], 1 }
 0x251   :  { %580 = vsyncpa [#allocation6 + $0x1], 1 }
 0x252   :  { %581 = vsyncpa [#allocation4], 1 }
 0x253   :  { %583 = vsyncpa [#allocation4 + $0x1], 1 }

</bundles_post_ra>
